<compile_context>
chip_gen: v6e
topology: v6e:2x2x1
jax: 0.10.0
libtpu: 0.0.40
codegen_flags: <defaults>
</compile_context>

<pallas_src>
import functools
import math

import numpy as np
import jax
import jax.numpy as jnp
from jax import lax
from jax.experimental import pallas as pl
from jax.experimental.pallas import tpu as pltpu


# ---------------------------------------------------------------------------
# Fused kernel: conv1(3x3)+ReLU -> conv2(1x1, full resolution) + relu(x1).
# Layout: channels on sublanes, N*H*W pixels on lanes.
# ---------------------------------------------------------------------------
def _fused_forward_kernel(x_ref, w1_ref, b1_ref, w2_ref, b2_ref, mask_ref,
                          v3_ref, v4_ref, *, shifts, npix):
    x = x_ref[...]                                      # (Cin, npix) f32

    # conv1 as 9 accumulated shifted matmuls (one per 3x3 tap).
    acc = None
    for k, d in enumerate(shifts):                      # unrolled, static
        s = (-d) % npix                                 # tap[:, p] = x[:, p + d]
        tap = x if s == 0 else pltpu.roll(x, s, 1)      # lane roll (XLU)
        tap = (tap * mask_ref[k:k + 1, :]).astype(jnp.bfloat16)
        part = jnp.dot(w1_ref[k], tap,                  # (Cmid,Cin)@(Cin,npix)
                       preferred_element_type=jnp.float32)
        acc = part if acc is None else acc + part

    v2 = jnp.maximum(acc + b1_ref[...], 0.0)            # (Cmid, npix) f32

    # conv2 (1x1) on every pixel; stride-2/pad-1 subsample happens outside.
    v3_ref[...] = (jnp.dot(w2_ref[...], v2.astype(jnp.bfloat16),
                           preferred_element_type=jnp.float32)
                   + b2_ref[...])                        # (Cout, npix) f32

    # v4 = relu(x1), reusing the already-resident input slab.
    v4_ref[...] = jnp.maximum(x, 0.0)


# ---------------------------------------------------------------------------
# Wrapper: tiny layout prep, one gridless pallas_call, cheap post-processing.
# ---------------------------------------------------------------------------
@jax.jit
def model_forward(x_nchw, params):
    """Returns (v3, v4) in NCHW.  See TODO about the final torch.mul."""
    w1, b1, w2, b2 = params                     # w1: (32,3,3,3) OIHW, w2: (16,32)
    N, Cin, H, W = x_nchw.shape
    Cmid, Cout = w1.shape[0], w2.shape[0]
    KH, KW = w1.shape[2], w1.shape[3]
    assert (KH, KW) == (3, 3) and H % 2 == 0 and W % 2 == 0
    npix = N * H * W
    OH = (H + 2 - 1) // 2 + 1                   # conv2: k=1, stride=2, pad=1
    OW = (W + 2 - 1) // 2 + 1

    # Channel-major, pixels-on-lanes layout; bf16 weights for the MXU.
    x_cm = jnp.transpose(x_nchw, (1, 0, 2, 3)).reshape(Cin, npix)
    w1_taps = jnp.transpose(w1, (2, 3, 0, 1)).reshape(KH * KW, Cmid, Cin)
    w1_taps = w1_taps.astype(jnp.bfloat16)
    b1_col = b1.reshape(Cmid, 1).astype(jnp.float32)
    w2_bf = w2.astype(jnp.bfloat16)
    b2_col = b2.reshape(Cout, 1).astype(jnp.float32)

    # Static per-tap lane shifts + 0/1 boundary masks (trace-time numpy).
    shifts = tuple((ky - 1) * W + (kx - 1) for ky in range(KH) for kx in range(KW))
    hh = np.arange(H).reshape(1, H, 1)
    ww = np.arange(W).reshape(1, 1, W)
    mrows = []
    for ky in range(KH):
        for kx in range(KW):
            ok = ((hh + ky - 1 >= 0) & (hh + ky - 1 < H)
                  & (ww + kx - 1 >= 0) & (ww + kx - 1 < W))
            mrows.append(np.broadcast_to(ok, (N, H, W)).reshape(npix))
    masks = jnp.asarray(np.stack(mrows).astype(np.float32))        # (9, npix)

    kernel = functools.partial(_fused_forward_kernel, shifts=shifts, npix=npix)
    vmem = pltpu.MemorySpace.VMEM
    v3_full, v4_cm = pl.pallas_call(
        kernel,
        in_specs=[pl.BlockSpec(memory_space=vmem)] * 6,
        out_specs=(pl.BlockSpec(memory_space=vmem),
                   pl.BlockSpec(memory_space=vmem)),
        out_shape=(jax.ShapeDtypeStruct((Cout, npix), jnp.float32),
                   jax.ShapeDtypeStruct((Cin, npix), jnp.float32)),
    )(x_cm, w1_taps, b1_col, w2_bf, b2_col, masks)

    # conv2 stride-2 / pad-1 subsample of the (already conv2'd) full-res map:
    # outputs with oi==0 or oj==0 only see the zero-padding ring of v2, so
    # they are exactly bias2; interior outputs are the odd-index pixels.
    v3_grid = v3_full.reshape(Cout, N, H, W).transpose(1, 0, 2, 3)
    inner = v3_grid[:, :, 1::2, 1::2]                   # (N, Cout, OH-1, OW-1)
    v3 = jnp.broadcast_to(b2.reshape(1, Cout, 1, 1), (N, Cout, OH, OW))
    v3 = v3.at[:, :, 1:, 1:].set(inner)

    v4 = v4_cm.reshape(Cin, N, H, W).transpose(1, 0, 2, 3)

    # TODO(synk): torch.mul(v3, v4) in the reference is broadcast-incompatible
    # ((N,16,OH,OW) vs (N,3,H,W)) and raises a RuntimeError in PyTorch for any
    # valid input to this module; the multiply cannot be reproduced, so the
    # two operands are returned instead.
    return v3, v4


# ---------------------------------------------------------------------------
# Main
# ---------------------------------------------------------------------------
if __name__ == "__main__":
    key = jax.random.PRNGKey(0)
    k1, k2, k3, k4, kx = jax.random.split(key, 5)

    # PyTorch-default-like uniform(-1/sqrt(fan_in), 1/sqrt(fan_in)) init (OIHW).
    fan1 = 3 * 3 * 3
    fan2 = 32 * 1 * 1
    w1 = jax.random.uniform(k1, (32, 3, 3, 3), jnp.float32,
                            -1.0 / math.sqrt(fan1), 1.0 / math.sqrt(fan1))
    b1 = jax.random.uniform(k2, (32,), jnp.float32,
                            -1.0 / math.sqrt(fan1), 1.0 / math.sqrt(fan1))
    w2 = jax.random.uniform(k3, (16, 32), jnp.float32,
                            -1.0 / math.sqrt(fan2), 1.0 / math.sqrt(fan2))
    b2 = jax.random.uniform(k4, (16,), jnp.float32,
                            -1.0 / math.sqrt(fan2), 1.0 / math.sqrt(fan2))
    params = (w1, b1, w2, b2)

    # Small input consistent with the module: (N=2, C=3, H=W=16).
    x = jax.random.normal(kx, (2, 3, 16, 16), jnp.float32)

    v3, v4 = model_forward(x, params)
    jax.block_until_ready((v3, v4))

    # Reference check against lax.conv_general_dilated (NCHW / OIHW, f32).
    v1_ref = lax.conv_general_dilated(
        x, w1, (1, 1), ((1, 1), (1, 1)),
        dimension_numbers=("NCHW", "OIHW", "NCHW")) + b1[None, :, None, None]
    v2_ref = jnp.maximum(v1_ref, 0.0)
    v3_ref = lax.conv_general_dilated(
        v2_ref, w2.reshape(16, 32, 1, 1), (2, 2), ((1, 1), (1, 1)),
        dimension_numbers=("NCHW", "OIHW", "NCHW")) + b2[None, :, None, None]
    v4_ref = jnp.maximum(x, 0.0)

    assert v3.shape == v3_ref.shape and v4.shape == v4_ref.shape
    assert jnp.allclose(v3, v3_ref, rtol=2e-2, atol=2e-2), \
        float(jnp.max(jnp.abs(v3 - v3_ref)))
    assert jnp.allclose(v4, v4_ref, rtol=1e-6, atol=1e-6)

    print("KERNEL_OK")
</pallas_src>

<mosaic_0001>
module attributes {stable_mosaic.version = 11 : i64} {
  func.func @_fused_forward_kernel(%arg0: memref<3x512xf32, #tpu.memory_space<vmem>>, %arg1: memref<9x32x3xbf16, #tpu.memory_space<vmem>>, %arg2: memref<32x1xf32, #tpu.memory_space<vmem>>, %arg3: memref<16x32xbf16, #tpu.memory_space<vmem>>, %arg4: memref<16x1xf32, #tpu.memory_space<vmem>>, %arg5: memref<9x512xf32, #tpu.memory_space<vmem>>, %arg6: memref<16x512xf32, #tpu.memory_space<vmem>>, %arg7: memref<3x512xf32, #tpu.memory_space<vmem>>) attributes {dimension_semantics = [], scalar_prefetch = 0 : i64, scratch_operands = 0 : i64, tpu.core_type = #tpu.core_type<tc>} {
    %c0 = arith.constant 0 : index
    %c0_0 = arith.constant 0 : index
    %0 = vector.load %arg0[%c0, %c0_0] : memref<3x512xf32, #tpu.memory_space<vmem>>, vector<3x512xf32>
    %c17_i32 = arith.constant 17 : i32
    %1 = tpu.dynamic_rotate %0 by %c17_i32 dim 1 : vector<3x512xf32>, i32 -> vector<3x512xf32>
    %c0_1 = arith.constant 0 : index
    %c0_2 = arith.constant 0 : index
    %2 = vector.load %arg5[%c0_1, %c0_2] : memref<9x512xf32, #tpu.memory_space<vmem>>, vector<1x512xf32>
    %3 = vector.broadcast %2 : vector<1x512xf32> to vector<3x512xf32>
    %4 = arith.mulf %1, %3 : vector<3x512xf32>
    %5 = arith.truncf %4 : vector<3x512xf32> to vector<3x512xbf16>
    %c0_3 = arith.constant 0 : index
    %c0_4 = arith.constant 0 : index
    %c0_5 = arith.constant 0 : index
    %6 = vector.load %arg1[%c0_3, %c0_4, %c0_5] : memref<9x32x3xbf16, #tpu.memory_space<vmem>>, vector<1x32x3xbf16>
    %7 = vector.shape_cast %6 : vector<1x32x3xbf16> to vector<32x3xbf16>
    %cst = arith.constant dense<0.000000e+00> : vector<32x512xf32>
    %8 = tpu.matmul %7, %5, %cst {dimension_numbers = #tpu.dot_dimension_numbers<[1], [0], [0], [1], [0, 0, 1, 1], [], []>} : vector<32x3xbf16>, vector<3x512xbf16>, vector<32x512xf32> -> vector<32x512xf32>
    %c16_i32 = arith.constant 16 : i32
    %9 = tpu.dynamic_rotate %0 by %c16_i32 dim 1 : vector<3x512xf32>, i32 -> vector<3x512xf32>
    %c1 = arith.constant 1 : index
    %c0_6 = arith.constant 0 : index
    %10 = vector.load %arg5[%c1, %c0_6] : memref<9x512xf32, #tpu.memory_space<vmem>>, vector<1x512xf32>
    %11 = vector.broadcast %10 : vector<1x512xf32> to vector<3x512xf32>
    %12 = arith.mulf %9, %11 : vector<3x512xf32>
    %13 = arith.truncf %12 : vector<3x512xf32> to vector<3x512xbf16>
    %c1_7 = arith.constant 1 : index
    %c0_8 = arith.constant 0 : index
    %c0_9 = arith.constant 0 : index
    %14 = vector.load %arg1[%c1_7, %c0_8, %c0_9] : memref<9x32x3xbf16, #tpu.memory_space<vmem>>, vector<1x32x3xbf16>
    %15 = vector.shape_cast %14 : vector<1x32x3xbf16> to vector<32x3xbf16>
    %cst_10 = arith.constant dense<0.000000e+00> : vector<32x512xf32>
    %16 = tpu.matmul %15, %13, %cst_10 {dimension_numbers = #tpu.dot_dimension_numbers<[1], [0], [0], [1], [0, 0, 1, 1], [], []>} : vector<32x3xbf16>, vector<3x512xbf16>, vector<32x512xf32> -> vector<32x512xf32>
    %17 = arith.addf %8, %16 : vector<32x512xf32>
    %c15_i32 = arith.constant 15 : i32
    %18 = tpu.dynamic_rotate %0 by %c15_i32 dim 1 : vector<3x512xf32>, i32 -> vector<3x512xf32>
    %c2 = arith.constant 2 : index
    %c0_11 = arith.constant 0 : index
    %19 = vector.load %arg5[%c2, %c0_11] : memref<9x512xf32, #tpu.memory_space<vmem>>, vector<1x512xf32>
    %20 = vector.broadcast %19 : vector<1x512xf32> to vector<3x512xf32>
    %21 = arith.mulf %18, %20 : vector<3x512xf32>
    %22 = arith.truncf %21 : vector<3x512xf32> to vector<3x512xbf16>
    %c2_12 = arith.constant 2 : index
    %c0_13 = arith.constant 0 : index
    %c0_14 = arith.constant 0 : index
    %23 = vector.load %arg1[%c2_12, %c0_13, %c0_14] : memref<9x32x3xbf16, #tpu.memory_space<vmem>>, vector<1x32x3xbf16>
    %24 = vector.shape_cast %23 : vector<1x32x3xbf16> to vector<32x3xbf16>
    %cst_15 = arith.constant dense<0.000000e+00> : vector<32x512xf32>
    %25 = tpu.matmul %24, %22, %cst_15 {dimension_numbers = #tpu.dot_dimension_numbers<[1], [0], [0], [1], [0, 0, 1, 1], [], []>} : vector<32x3xbf16>, vector<3x512xbf16>, vector<32x512xf32> -> vector<32x512xf32>
    %26 = arith.addf %17, %25 : vector<32x512xf32>
    %c1_i32 = arith.constant 1 : i32
    %27 = tpu.dynamic_rotate %0 by %c1_i32 dim 1 : vector<3x512xf32>, i32 -> vector<3x512xf32>
    %c3 = arith.constant 3 : index
    %c0_16 = arith.constant 0 : index
    %28 = vector.load %arg5[%c3, %c0_16] : memref<9x512xf32, #tpu.memory_space<vmem>>, vector<1x512xf32>
    %29 = vector.broadcast %28 : vector<1x512xf32> to vector<3x512xf32>
    %30 = arith.mulf %27, %29 : vector<3x512xf32>
    %31 = arith.truncf %30 : vector<3x512xf32> to vector<3x512xbf16>
    %c3_17 = arith.constant 3 : index
    %c0_18 = arith.constant 0 : index
    %c0_19 = arith.constant 0 : index
    %32 = vector.load %arg1[%c3_17, %c0_18, %c0_19] : memref<9x32x3xbf16, #tpu.memory_space<vmem>>, vector<1x32x3xbf16>
    %33 = vector.shape_cast %32 : vector<1x32x3xbf16> to vector<32x3xbf16>
    %cst_20 = arith.constant dense<0.000000e+00> : vector<32x512xf32>
    %34 = tpu.matmul %33, %31, %cst_20 {dimension_numbers = #tpu.dot_dimension_numbers<[1], [0], [0], [1], [0, 0, 1, 1], [], []>} : vector<32x3xbf16>, vector<3x512xbf16>, vector<32x512xf32> -> vector<32x512xf32>
    %35 = arith.addf %26, %34 : vector<32x512xf32>
    %c4 = arith.constant 4 : index
    %c0_21 = arith.constant 0 : index
    %36 = vector.load %arg5[%c4, %c0_21] : memref<9x512xf32, #tpu.memory_space<vmem>>, vector<1x512xf32>
    %37 = vector.broadcast %36 : vector<1x512xf32> to vector<3x512xf32>
    %38 = arith.mulf %0, %37 : vector<3x512xf32>
    %39 = arith.truncf %38 : vector<3x512xf32> to vector<3x512xbf16>
    %c4_22 = arith.constant 4 : index
    %c0_23 = arith.constant 0 : index
    %c0_24 = arith.constant 0 : index
    %40 = vector.load %arg1[%c4_22, %c0_23, %c0_24] : memref<9x32x3xbf16, #tpu.memory_space<vmem>>, vector<1x32x3xbf16>
    %41 = vector.shape_cast %40 : vector<1x32x3xbf16> to vector<32x3xbf16>
    %cst_25 = arith.constant dense<0.000000e+00> : vector<32x512xf32>
    %42 = tpu.matmul %41, %39, %cst_25 {dimension_numbers = #tpu.dot_dimension_numbers<[1], [0], [0], [1], [0, 0, 1, 1], [], []>} : vector<32x3xbf16>, vector<3x512xbf16>, vector<32x512xf32> -> vector<32x512xf32>
    %43 = arith.addf %35, %42 : vector<32x512xf32>
    %c511_i32 = arith.constant 511 : i32
    %44 = tpu.dynamic_rotate %0 by %c511_i32 dim 1 : vector<3x512xf32>, i32 -> vector<3x512xf32>
    %c5 = arith.constant 5 : index
    %c0_26 = arith.constant 0 : index
    %45 = vector.load %arg5[%c5, %c0_26] : memref<9x512xf32, #tpu.memory_space<vmem>>, vector<1x512xf32>
    %46 = vector.broadcast %45 : vector<1x512xf32> to vector<3x512xf32>
    %47 = arith.mulf %44, %46 : vector<3x512xf32>
    %48 = arith.truncf %47 : vector<3x512xf32> to vector<3x512xbf16>
    %c5_27 = arith.constant 5 : index
    %c0_28 = arith.constant 0 : index
    %c0_29 = arith.constant 0 : index
    %49 = vector.load %arg1[%c5_27, %c0_28, %c0_29] : memref<9x32x3xbf16, #tpu.memory_space<vmem>>, vector<1x32x3xbf16>
    %50 = vector.shape_cast %49 : vector<1x32x3xbf16> to vector<32x3xbf16>
    %cst_30 = arith.constant dense<0.000000e+00> : vector<32x512xf32>
    %51 = tpu.matmul %50, %48, %cst_30 {dimension_numbers = #tpu.dot_dimension_numbers<[1], [0], [0], [1], [0, 0, 1, 1], [], []>} : vector<32x3xbf16>, vector<3x512xbf16>, vector<32x512xf32> -> vector<32x512xf32>
    %52 = arith.addf %43, %51 : vector<32x512xf32>
    %c497_i32 = arith.constant 497 : i32
    %53 = tpu.dynamic_rotate %0 by %c497_i32 dim 1 : vector<3x512xf32>, i32 -> vector<3x512xf32>
    %c6 = arith.constant 6 : index
    %c0_31 = arith.constant 0 : index
    %54 = vector.load %arg5[%c6, %c0_31] : memref<9x512xf32, #tpu.memory_space<vmem>>, vector<1x512xf32>
    %55 = vector.broadcast %54 : vector<1x512xf32> to vector<3x512xf32>
    %56 = arith.mulf %53, %55 : vector<3x512xf32>
    %57 = arith.truncf %56 : vector<3x512xf32> to vector<3x512xbf16>
    %c6_32 = arith.constant 6 : index
    %c0_33 = arith.constant 0 : index
    %c0_34 = arith.constant 0 : index
    %58 = vector.load %arg1[%c6_32, %c0_33, %c0_34] : memref<9x32x3xbf16, #tpu.memory_space<vmem>>, vector<1x32x3xbf16>
    %59 = vector.shape_cast %58 : vector<1x32x3xbf16> to vector<32x3xbf16>
    %cst_35 = arith.constant dense<0.000000e+00> : vector<32x512xf32>
    %60 = tpu.matmul %59, %57, %cst_35 {dimension_numbers = #tpu.dot_dimension_numbers<[1], [0], [0], [1], [0, 0, 1, 1], [], []>} : vector<32x3xbf16>, vector<3x512xbf16>, vector<32x512xf32> -> vector<32x512xf32>
    %61 = arith.addf %52, %60 : vector<32x512xf32>
    %c496_i32 = arith.constant 496 : i32
    %62 = tpu.dynamic_rotate %0 by %c496_i32 dim 1 : vector<3x512xf32>, i32 -> vector<3x512xf32>
    %c7 = arith.constant 7 : index
    %c0_36 = arith.constant 0 : index
    %63 = vector.load %arg5[%c7, %c0_36] : memref<9x512xf32, #tpu.memory_space<vmem>>, vector<1x512xf32>
    %64 = vector.broadcast %63 : vector<1x512xf32> to vector<3x512xf32>
    %65 = arith.mulf %62, %64 : vector<3x512xf32>
    %66 = arith.truncf %65 : vector<3x512xf32> to vector<3x512xbf16>
    %c7_37 = arith.constant 7 : index
    %c0_38 = arith.constant 0 : index
    %c0_39 = arith.constant 0 : index
    %67 = vector.load %arg1[%c7_37, %c0_38, %c0_39] : memref<9x32x3xbf16, #tpu.memory_space<vmem>>, vector<1x32x3xbf16>
    %68 = vector.shape_cast %67 : vector<1x32x3xbf16> to vector<32x3xbf16>
    %cst_40 = arith.constant dense<0.000000e+00> : vector<32x512xf32>
    %69 = tpu.matmul %68, %66, %cst_40 {dimension_numbers = #tpu.dot_dimension_numbers<[1], [0], [0], [1], [0, 0, 1, 1], [], []>} : vector<32x3xbf16>, vector<3x512xbf16>, vector<32x512xf32> -> vector<32x512xf32>
    %70 = arith.addf %61, %69 : vector<32x512xf32>
    %c495_i32 = arith.constant 495 : i32
    %71 = tpu.dynamic_rotate %0 by %c495_i32 dim 1 : vector<3x512xf32>, i32 -> vector<3x512xf32>
    %c8 = arith.constant 8 : index
    %c0_41 = arith.constant 0 : index
    %72 = vector.load %arg5[%c8, %c0_41] : memref<9x512xf32, #tpu.memory_space<vmem>>, vector<1x512xf32>
    %73 = vector.broadcast %72 : vector<1x512xf32> to vector<3x512xf32>
    %74 = arith.mulf %71, %73 : vector<3x512xf32>
    %75 = arith.truncf %74 : vector<3x512xf32> to vector<3x512xbf16>
    %c8_42 = arith.constant 8 : index
    %c0_43 = arith.constant 0 : index
    %c0_44 = arith.constant 0 : index
    %76 = vector.load %arg1[%c8_42, %c0_43, %c0_44] : memref<9x32x3xbf16, #tpu.memory_space<vmem>>, vector<1x32x3xbf16>
    %77 = vector.shape_cast %76 : vector<1x32x3xbf16> to vector<32x3xbf16>
    %cst_45 = arith.constant dense<0.000000e+00> : vector<32x512xf32>
    %78 = tpu.matmul %77, %75, %cst_45 {dimension_numbers = #tpu.dot_dimension_numbers<[1], [0], [0], [1], [0, 0, 1, 1], [], []>} : vector<32x3xbf16>, vector<3x512xbf16>, vector<32x512xf32> -> vector<32x512xf32>
    %79 = arith.addf %70, %78 : vector<32x512xf32>
    %c0_46 = arith.constant 0 : index
    %c0_47 = arith.constant 0 : index
    %80 = vector.load %arg2[%c0_46, %c0_47] : memref<32x1xf32, #tpu.memory_space<vmem>>, vector<32x1xf32>
    %81 = vector.broadcast %80 : vector<32x1xf32> to vector<32x512xf32>
    %82 = arith.addf %79, %81 : vector<32x512xf32>
    %cst_48 = arith.constant 0.000000e+00 : f32
    %83 = vector.broadcast %cst_48 : f32 to vector<32x512xf32>
    %84 = arith.maximumf %82, %83 : vector<32x512xf32>
    %c0_49 = arith.constant 0 : index
    %c0_50 = arith.constant 0 : index
    %85 = vector.load %arg3[%c0_49, %c0_50] : memref<16x32xbf16, #tpu.memory_space<vmem>>, vector<16x32xbf16>
    %86 = arith.truncf %84 : vector<32x512xf32> to vector<32x512xbf16>
    %cst_51 = arith.constant dense<0.000000e+00> : vector<16x512xf32>
    %87 = tpu.matmul %85, %86, %cst_51 {dimension_numbers = #tpu.dot_dimension_numbers<[1], [0], [0], [1], [0, 0, 1, 1], [], []>} : vector<16x32xbf16>, vector<32x512xbf16>, vector<16x512xf32> -> vector<16x512xf32>
    %c0_52 = arith.constant 0 : index
    %c0_53 = arith.constant 0 : index
    %88 = vector.load %arg4[%c0_52, %c0_53] : memref<16x1xf32, #tpu.memory_space<vmem>>, vector<16x1xf32>
    %89 = vector.broadcast %88 : vector<16x1xf32> to vector<16x512xf32>
    %90 = arith.addf %87, %89 : vector<16x512xf32>
    %c0_54 = arith.constant 0 : index
    %c0_55 = arith.constant 0 : index
    %91 = vector.load %arg6[%c0_54, %c0_55] : memref<16x512xf32, #tpu.memory_space<vmem>>, vector<16x512xf32>
    tpu.vector_store %arg6[%c0_54, %c0_55], %90 {strides = array<i32>} : memref<16x512xf32, #tpu.memory_space<vmem>>, vector<16x512xf32>,
    %cst_56 = arith.constant 0.000000e+00 : f32
    %92 = vector.broadcast %cst_56 : f32 to vector<3x512xf32>
    %93 = arith.maximumf %0, %92 : vector<3x512xf32>
    %c0_57 = arith.constant 0 : index
    %c0_58 = arith.constant 0 : index
    %94 = vector.load %arg7[%c0_57, %c0_58] : memref<3x512xf32, #tpu.memory_space<vmem>>, vector<3x512xf32>
    tpu.vector_store %arg7[%c0_57, %c0_58], %93 {strides = array<i32>} : memref<3x512xf32, #tpu.memory_space<vmem>>, vector<3x512xf32>,
    return
  }
}

</mosaic_0001>

<bundles_post_ra>
// kernel: model_forward.1
= control target key start
LH: loop header
LB: loop body
LE: loop exit
PB: predicated region body
PF: predicated region fallthrough
CT: control target
= control target key end

     0   :  { %s2112_s28 = smov 16   ;;  %v2113_v6 = vmov 0   ;;  %s2114_s9 = smov 17   ;;  %v42_v7 = vlaneseq  ;;  %vm149_vm1 = vcmask 1040384   ;;  %vm150_vm3 = vcmask 1041408   ;;  %s2682_s0 = inlined_call_operand.vmem [shape: f32[3,512], index: 0, kind: input, shape index: {}]   ;;  %s2683_s7 = inlined_call_operand.vmem [shape: f32[3,512], index: 7, kind: output, shape index: {1}]   ;;  %s2684_s1 = inlined_call_operand.vmem [shape: bf16[9,32,3], index: 1, kind: input, shape index: {}]   ;;  %s2685_s5 = inlined_call_operand.vmem [shape: f32[9,512], index: 5, kind: input, shape index: {}]   ;;  %s2686_s2 = inlined_call_operand.vmem [shape: f32[32,1], index: 2, kind: input, shape index: {}]   ;;  %s2687_s4 = inlined_call_operand.vmem [shape: f32[16,1], index: 4, kind: input, shape index: {}]   ;;  %s2688_s3 = inlined_call_operand.vmem [shape: bf16[16,32], index: 3, kind: input, shape index: {}]   ;;  %s2689_s6 = inlined_call_operand.vmem [shape: f32[16,512], index: 6, kind: output, shape index: {0}]  }
   0x1   :  { %v2165_v0 = vld [vmem:[%s2682_s0 + $0x8] sm:$0x77]  ;;  %v2170_v1 = vld [vmem:[%s2682_s0] sm:$0x77]  ;;  %197 = vmatprep.mubr.bf16.mxu0 %v2113_v6  ;;  %250 = vmatprep.mubr.bf16.mxu1 %v2113_v6  ;;  %s2115_s10 = smov 15   ;;  %s2117_s11 = smov 127  }
   0x2   :  { %87 = vrot.lane.b32.xlu1 %v2165_v0, %s2112_s28  ;;  %v1971_v2 = vmax.f32 %v2165_v0, 0.0  ;;  %83 = vrot.lane.b32.xlu0 %v2170_v1, %s2112_s28  ;;  %v1970_v3 = vmax.f32 %v2170_v1, 0.0  ;;  %v31_v4 = vcombine.high %v2165_v0, %v2165_v0  ;;  %v30_v5 = vcombine.high %v2170_v1, %v2170_v1  ;;  %s2118_s12 = smov 113   ;;  %s2119_s13 = smov 112   ;;  %v2093_v55 = vld [vmem:[%s2684_s1 + $0x10] sm:$0xff]  }
   0x3   :  { %2090 = vset.pattern.permute.xlu1 %v2113_v6  ;;  %2089 = vset.pattern.permute.xlu0 %v2113_v6  ;;  %s2120_s14 = smov 111   ;;  %v52_v8 = vshrl.u32 %v42_v7, 7  ;;  %v2204_v9 = vand.u32 127, %v42_v7  ;;  %v1982_v14 = vld [vmem:[%s2685_s5 + $0x1] ss:$8 sm:$0xf] }
   0x4   :  { %1973 = vst [vmem:[%s2683_s7 + $0x8] sm:$0x77] %v1971_v2  ;;  %1972 = vst [vmem:[%s2683_s7] sm:$0x77] %v1970_v3  ;;  %s2116_s7 = smov 1   ;;  %v2121_v25 = vmov 65535   ;;  %vm142_vm4 = vcmask 23552  }
   0x5   :  { %v2206_v10 = vsub.s32 0, %v52_v8  ;;  %v2208_v11 = vsub.s32 2, %v52_v8  ;;  %v2210_v12 = vsub.s32 1, %v52_v8  ;;  %v2212_v13 = vsub.s32 3, %v52_v8 }
   0x6   :  { %89 = vrot.lane.b32.xlu1 %v31_v4, %s2112_s28  ;;  %85 = vrot.lane.b32.xlu0 %v30_v5, %s2112_s28  ;;  %vm91_vm0 = vcmp.lt.s32.totalorder %v2204_v9, 16  ;;  %v49_v17 = vld [vmem:[%s2685_s5] ss:$8 sm:$0xf]  ;;  %vm44_vm2 = vcmp.lt.s32.totalorder %v2204_v9, 17  ;;  %v151_v26 = vsel %vm149_vm1, 4294967295, %v2121_v25 }
   0x7   :  { %v102_v18 = vrot.slane %v1982_v14, %v2206_v10  ;;  %v110_v19 = vrot.slane %v1982_v14, %v2208_v11  ;;  %v114_v20 = vrot.slane %v1982_v14, %v2212_v13  ;;  %v106_v21 = vrot.slane %v1982_v14, %v2210_v12  ;;  %v1999_v46 = vld [vmem:[%s2685_s5 + $0x2] ss:$8 sm:$0xf] }
   0x8   :  { %v58_v24 = vrot.slane %v49_v17, %v2210_v12  ;;  %v2235_v35 = vsel %vm150_vm3, %v151_v26, 0  ;;  %v54_v43 = vrot.slane %v49_v17, %v2206_v10  ;;  %v62_v44 = vrot.slane %v49_v17, %v2208_v11 }
   0x9   :  { %v66_v45 = vrot.slane %v49_v17, %v2212_v13  ;;  %v428_v56 = vrot.slane %v1999_v46, %v2210_v12  ;;  %vm413_vm5 = vcmp.lt.s32.totalorder %v2204_v9, 15  ;;  %v424_v2 = vrot.slane %v1999_v46, %v2206_v10 }
   0xa   :  { %36 = vrot.lane.b32.xlu1 %v30_v5, %s2114_s9  ;;  %34 = vrot.lane.b32.xlu0 %v2170_v1, %s2114_s9  ;;  %vm612_vm6 = vcmp.lt.s32.totalorder %v2204_v9, 1  ;;  %vm1001_vm7 = vcmp.lt.s32.totalorder %v2204_v9, 127  ;;  %vm1200_vm8 = vcmp.lt.s32.totalorder %v2204_v9, 113  ;;  %vm1399_vm9 = vcmp.lt.s32.totalorder %v2204_v9, 112 }
   0xb   :  { %vm1598_vm10 = vcmp.lt.s32.totalorder %v2204_v9, 111  ;;  %v2107_v9 = vld [vmem:[%s2684_s1 + $0x70] sm:$0xff]   ;;  %vm1872_vm11 = vcmask 261120  }
   0xe   :  { %40 = vrot.lane.b32.xlu1 %v31_v4, %s2114_s9  ;;  %38 = vrot.lane.b32.xlu0 %v2165_v0, %s2114_s9 }
  0x12   :  { %407 = vrot.lane.b32.xlu1 %v30_v5, %s2115_s10  ;;  %405 = vrot.lane.b32.xlu0 %v2170_v1, %s2115_s10 }
  0x16   :  { %411 = vrot.lane.b32.xlu1 %v31_v4, %s2115_s10  ;;  %409 = vrot.lane.b32.xlu0 %v2165_v0, %s2115_s10 }
  0x1a   :  { %606 = vrot.lane.b32.xlu1 %v30_v5, %s2116_s7  ;;  %604 = vrot.lane.b32.xlu0 %v2170_v1, %s2116_s7 }
  0x1e   :  { %610 = vrot.lane.b32.xlu1 %v31_v4, %s2116_s7  ;;  %608 = vrot.lane.b32.xlu0 %v2165_v0, %s2116_s7 }
  0x22   :  { %993 = vrot.lane.b32.xlu0 %v2170_v1, %s2117_s11  ;;  %995 = vrot.lane.b32.xlu1 %v30_v5, %s2117_s11 }
  0x26   :  { %997 = vrot.lane.b32.xlu0 %v2165_v0, %s2117_s11  ;;  %999 = vrot.lane.b32.xlu1 %v31_v4, %s2117_s11 }
  0x2a   :  { %1192 = vrot.lane.b32.xlu0 %v2170_v1, %s2118_s12  ;;  %1194 = vrot.lane.b32.xlu1 %v30_v5, %s2118_s12 }
  0x2e   :  { %1196 = vrot.lane.b32.xlu0 %v2165_v0, %s2118_s12  ;;  %1198 = vrot.lane.b32.xlu1 %v31_v4, %s2118_s12 }
  0x32   :  { %1391 = vrot.lane.b32.xlu0 %v2170_v1, %s2119_s13  ;;  %1393 = vrot.lane.b32.xlu1 %v30_v5, %s2119_s13 }
  0x36   :  { %1395 = vrot.lane.b32.xlu0 %v2165_v0, %s2119_s13  ;;  %1397 = vrot.lane.b32.xlu1 %v31_v4, %s2119_s13 }
  0x3a   :  { %1590 = vrot.lane.b32.xlu0 %v2170_v1, %s2120_s14  ;;  %1592 = vrot.lane.b32.xlu1 %v30_v5, %s2120_s14 }
  0x3e   :  { %1594 = vrot.lane.b32.xlu0 %v2165_v0, %s2120_s14  ;;  %1596 = vrot.lane.b32.xlu1 %v31_v4, %s2120_s14 }
  0x74   :  { %v88_v15 = vpop.permute.xlu1 %87  ;;  %v84_v16 = vpop.permute.xlu0 %83 }
  0x78   :  { %v90_v22 = vpop.permute.xlu1 %89  ;;  %v86_v23 = vpop.permute.xlu0 %85 }
  0x79   :  { %v92_v27 = vsel %vm91_vm0, %v88_v15, %v90_v22  ;;  %v95_v28 = vsel %vm91_vm0, %v90_v22, %v84_v16  ;;  %v93_v29 = vsel %vm91_vm0, %v86_v23, %v88_v15  ;;  %v94_v30 = vsel %vm91_vm0, %v84_v16, %v86_v23  ;;  %v2094_v23 = vld [vmem:[%s2684_s1 + $0x18] sm:$0xff]  }
  0x7a   :  { %v119_v31 = vmul.f32 %v102_v18, %v95_v28  ;;  %v121_v32 = vmul.f32 %v110_v19, %v93_v29  ;;  %v122_v33 = vmul.f32 %v114_v20, %v92_v27  ;;  %v120_v34 = vmul.f32 %v106_v21, %v94_v30  ;;  %v2276_v21 = vld [vmem:[%s2685_s5 + $0x3] ss:$8 sm:$0xf] }
  0x7b   :  { %v432_v15 = vrot.slane %v1999_v46, %v2208_v11  ;;  %v436_v16 = vrot.slane %v1999_v46, %v2212_v13  ;;  %v627_v29 = vrot.slane %v2276_v21, %v2210_v12 }
  0x7c   :  { %v123_v36 = vpack.c.bf16 %v119_v31, %v119_v31  ;;  %v125_v37 = vpack.c.bf16 %v121_v32, %v121_v32  ;;  %v37_v38 = vpop.permute.xlu1 %36  ;;  %v35_v39 = vpop.permute.xlu0 %34  ;;  %v126_v40 = vpack.c.bf16 %v122_v33, %v122_v33  ;;  %v124_v41 = vpack.c.bf16 %v120_v34, %v120_v34 }
  0x7d   :  { %v47_v42 = vsel %vm44_vm2, %v35_v39, %v37_v38 }
  0x7e   :  { %v72_v47 = vmul.f32 %v58_v24, %v47_v42  ;;  %v163_v48 = vand.u32 %v2235_v35, %v126_v40  ;;  %v157_v49 = vand.u32 %v2235_v35, %v124_v41  ;;  %v154_v50 = vand.u32 %v2235_v35, %v123_v36 }
  0x7f   :  { %v160_v51 = vand.u32 %v2235_v35, %v125_v37 }
  0x80   :  { %v76_v52 = vpack.c.bf16 %v72_v47, %v72_v47  ;;  %232 = vmatprep.subr.bf16.mxu1 %v163_v48  ;;  %v41_v53 = vpop.permute.xlu1 %40  ;;  %179 = vmatprep.subr.bf16.mxu0 %v157_v49  ;;  %v39_v54 = vpop.permute.xlu0 %38  ;;  %v2095_v49 = vld [vmem:[%s2684_s1] sm:$0xff]  }
  0x81   :  { %v48_v57 = vsel %vm44_vm2, %v41_v53, %v35_v39  ;;  %v45_v58 = vsel %vm44_vm2, %v39_v54, %v41_v53  ;;  %v46_v59 = vsel %vm44_vm2, %v37_v38, %v39_v54  ;;  %180 = vmatpush1.bf16.msra.mxu0 %v154_v50  ;;  %233 = vmatpush1.bf16.msra.mxu1 %v160_v51  ;;  %v2021_v38 = vld [vmem:[%s2685_s5 + $0x4] ss:$8 sm:$0xf] }
  0x82   :  { %v71_v60 = vmul.f32 %v54_v43, %v48_v57  ;;  %v73_v61 = vmul.f32 %v62_v44, %v46_v59  ;;  %v74_v62 = vmul.f32 %v66_v45, %v45_v58  ;;  %v291_v63 = vand.u32 %v2235_v35, %v76_v52 }
  0x83   :  { %v635_v44 = vrot.slane %v2276_v21, %v2212_v13  ;;  %v809_v45 = vrot.slane %v2021_v38, %v2206_v10  ;;  %v813_v46 = vrot.slane %v2021_v38, %v2210_v12  ;;  %v817_v47 = vrot.slane %v2021_v38, %v2208_v11 }
  0x84   :  { %v75_v3 = vpack.c.bf16 %v71_v60, %v71_v60  ;;  %v77_v4 = vpack.c.bf16 %v73_v61, %v73_v61  ;;  %v78_v5 = vpack.c.bf16 %v74_v62, %v74_v62  ;;  %1989 = vmatmul.mubr.msk.bf16.vlgmr.msra.gmra.mxu0 %vm142_vm4, %v2093_v55  ;;  %1991 = vmatmul.mubr.msk.bf16.vlgmr.msra.gmra.mxu1 %vm142_vm4, %v2093_v55  ;;  %v408_v7 = vpop.permute.xlu1 %407  ;;  %v406_v8 = vpop.permute.xlu0 %405 }
  0x85   :  { %313 = vmatprep.subr.bf16.mxu0 %v291_v63  ;;  %207 = vmatprep.mubr.bf16.mxu0 %v2113_v6  ;;  %v416_v14 = vsel %vm413_vm5, %v406_v8, %v408_v7  ;;  %v821_v48 = vrot.slane %v2021_v38, %v2212_v13  ;;  %v822_v58 = vcombine.low %v809_v45, %v813_v46 }
  0x86   :  { %v288_v17 = vand.u32 %v2235_v35, %v75_v3  ;;  %v294_v18 = vand.u32 %v2235_v35, %v77_v4  ;;  %v297_v19 = vand.u32 %v2235_v35, %v78_v5  ;;  %260 = vmatprep.mubr.bf16.mxu1 %v2113_v6  ;;  %v442_v20 = vmul.f32 %v428_v56, %v416_v14 }
  0x87   :  { %v823_v59 = vcombine.low %v817_v47, %v821_v48  ;;  %v623_v61 = vrot.slane %v2276_v21, %v2206_v10  ;;  %v631_v62 = vrot.slane %v2276_v21, %v2208_v11  ;;  %v826_v4 = vmul.f32 %v822_v58, %v2170_v1  ;;  %v2097_v21 = vld [vmem:[%s2684_s1 + $0x20] sm:$0xff]  }
  0x88   :  { %314 = vmatpush1.bf16.msra.mxu0 %v288_v17  ;;  %366 = vmatprep.subr.bf16.mxu1 %v297_v19  ;;  %v446_v22 = vpack.c.bf16 %v442_v20, %v442_v20  ;;  %v412_v24 = vpop.permute.xlu1 %411  ;;  %v410_v25 = vpop.permute.xlu0 %409  ;;  %v2377_v48 = vld [vmem:[%s2685_s5 + $0x6] ss:$8 sm:$0xf] }
  0x89   :  { %367 = vmatpush1.bf16.msra.mxu1 %v294_v18  ;;  %v417_v26 = vsel %vm413_vm5, %v412_v24, %v406_v8  ;;  %v414_v27 = vsel %vm413_vm5, %v410_v25, %v412_v24  ;;  %v415_v28 = vsel %vm413_vm5, %v408_v7, %v410_v25  ;;  %v827_v5 = vmul.f32 %v823_v59, %v2165_v0  ;;  %v2096_v7 = vld [vmem:[%s2684_s1 + $0x8] sm:$0xff]  }
  0x8a   :  { %v441_v30 = vmul.f32 %v424_v2, %v417_v26  ;;  %v443_v31 = vmul.f32 %v432_v15, %v415_v28  ;;  %v444_v32 = vmul.f32 %v436_v16, %v414_v27  ;;  %v474_v33 = vand.u32 %v446_v22, %v2235_v35  ;;  %v2032_v26 = vld [vmem:[%s2685_s5 + $0x5] ss:$8 sm:$0xf] }
  0x8b   :  { %v830_v15 = vcombine.high %v826_v4, %v826_v4  ;;  %v831_v16 = vcombine.high %v827_v5, %v827_v5  ;;  %v836_v38 = vpack.c.bf16 %v827_v5, %v827_v5 }
  0x8c   :  { %1990 = vmatmul.mubr.msk.bf16.gmra.mxu0 %vm142_vm4, %v2094_v23  ;;  %1992 = vmatmul.mubr.msk.bf16.gmra.mxu1 %vm142_vm4, %v2094_v23  ;;  %v448_v34 = vpack.c.bf16 %v444_v32, %v444_v32  ;;  %v607_v36 = vpop.permute.xlu1 %606  ;;  %v605_v37 = vpop.permute.xlu0 %604  ;;  %v445_v39 = vpack.c.bf16 %v441_v30, %v441_v30  ;;  %v447_v40 = vpack.c.bf16 %v443_v31, %v443_v31  ;;  %v2098_v31 = vld [vmem:[%s2684_s1 + $0x28] sm:$0xff]  }
  0x8d   :  { %331 = vmatprep.mubr.bf16.mxu0 %v2113_v6  ;;  %384 = vmatprep.mubr.bf16.mxu1 %v2113_v6  ;;  %v615_v41 = vsel %vm612_vm6, %v605_v37, %v607_v36  ;;  %v835_v19 = vpack.c.bf16 %v830_v15, %v830_v15  ;;  %v837_v20 = vpack.c.bf16 %v831_v16, %v831_v16 }
  0x8e   :  { %496 = vmatprep.subr.bf16.mxu0 %v474_v33  ;;  %v480_v42 = vand.u32 %v448_v34, %v2235_v35  ;;  %v641_v43 = vmul.f32 %v627_v29, %v615_v41  ;;  %v471_v53 = vand.u32 %v445_v39, %v2235_v35  ;;  %v477_v54 = vand.u32 %v447_v40, %v2235_v35 }
  0x8f   :  { %v863_v24 = vand.u32 %v835_v19, %v2235_v35  ;;  %v869_v25 = vand.u32 %v837_v20, %v2235_v35  ;;  %v1016_v29 = vrot.slane %v2032_v26, %v2210_v12  ;;  %v1024_v30 = vrot.slane %v2032_v26, %v2212_v13 }
  0x90   :  { %549 = vmatprep.subr.bf16.mxu1 %v480_v42  ;;  %v645_v50 = vpack.c.bf16 %v641_v43, %v641_v43  ;;  %v611_v51 = vpop.permute.xlu1 %610  ;;  %v609_v52 = vpop.permute.xlu0 %608  ;;  %v2099_v43 = vld [vmem:[%s2684_s1 + $0x30] sm:$0xff]   ;;  %v866_v45 = vand.u32 %v836_v38, %v2235_v35 }
  0x91   :  { %v613_v55 = vsel %vm612_vm6, %v609_v52, %v611_v51  ;;  %v616_v63 = vsel %vm612_vm6, %v611_v51, %v605_v37  ;;  %v614_v2 = vsel %vm612_vm6, %v607_v36, %v609_v52  ;;  %v834_v37 = vpack.c.bf16 %v826_v4, %v826_v4 }
  0x92   :  { %v643_v56 = vmul.f32 %v635_v44, %v613_v55  ;;  %v673_v57 = vand.u32 %v645_v50, %v2235_v35  ;;  %v640_v8 = vmul.f32 %v623_v61, %v616_v63  ;;  %v642_v14 = vmul.f32 %v631_v62, %v614_v2 }
  0x93   :  { %v860_v44 = vand.u32 %v834_v37, %v2235_v35  ;;  %v1215_v55 = vrot.slane %v2377_v48, %v2210_v12 }
  0x94   :  { %1995 = vmatmul.mubr.msk.bf16.vlgmr.msra.gmra.mxu0 %vm142_vm4, %v2095_v49  ;;  %1997 = vmatmul.mubr.msk.bf16.vlgmr.msra.gmra.mxu1 %vm142_vm4, %v2095_v49  ;;  %v647_v60 = vpack.c.bf16 %v643_v56, %v643_v56  ;;  %v644_v17 = vpack.c.bf16 %v640_v8, %v640_v8  ;;  %v646_v18 = vpack.c.bf16 %v642_v14, %v642_v14  ;;  %v994_v0 = vpop.permute.xlu0 %993  ;;  %v996_v1 = vpop.permute.xlu1 %995  ;;  %v2101_v14 = vld [vmem:[%s2684_s1 + $0x40] sm:$0xff]  }
  0x95   :  { %497 = vmatpush1.bf16.msra.mxu0 %v471_v53  ;;  %550 = vmatpush1.bf16.msra.mxu1 %v477_v54  ;;  %v1012_v49 = vrot.slane %v2032_v26, %v2206_v10  ;;  %v1004_v52 = vsel %vm1001_vm7, %v994_v0, %v996_v1  ;;  %v1020_v53 = vrot.slane %v2032_v26, %v2208_v11  ;;  %v1792_v26 = vld [vmem:[%s2686_s2 + $0x18] sm:$0xff] }
  0x96   :  { %341 = vmatprep.mubr.bf16.mxu0 %v2113_v6  ;;  %394 = vmatprep.mubr.bf16.mxu1 %v2113_v6  ;;  %v679_v3 = vand.u32 %v647_v60, %v2235_v35  ;;  %v670_v22 = vand.u32 %v644_v17, %v2235_v35  ;;  %v676_v23 = vand.u32 %v646_v18, %v2235_v35 }
  0x97   :  { %695 = vmatprep.subr.bf16.mxu0 %v673_v57  ;;  %v1223_v56 = vrot.slane %v2377_v48, %v2212_v13  ;;  %v2100_v57 = vld [vmem:[%s2684_s1 + $0x38] sm:$0xff]   ;;  %v1029_v60 = vmul.f32 %v1012_v49, %v1004_v52  ;;  %1810 = vperm.xlu1 %2090, %v1792_v26   ;;  %v2110_v26 = vld [vmem:[%s2684_s1 + $0x88] sm:$0xff]  }
  0x98   :  { %748 = vmatprep.subr.bf16.mxu1 %v679_v3  ;;  %v998_v27 = vpop.permute.xlu0 %997  ;;  %v1000_v28 = vpop.permute.xlu1 %999  ;;  %v2065_v49 = vld [vmem:[%s2685_s5 + $0x20] ss:$8 sm:$0xf] }
  0x99   :  { %v1003_v32 = vsel %vm1001_vm7, %v996_v1, %v998_v27  ;;  %v1005_v33 = vsel %vm1001_vm7, %v1000_v28, %v994_v0  ;;  %v1002_v54 = vsel %vm1001_vm7, %v998_v27, %v1000_v28  ;;  %v1033_v2 = vpack.c.bf16 %v1029_v60, %v1029_v60  ;;  %v2419_v0 = vld [vmem:[%s2685_s5 + $0x7] ss:$8 sm:$0xf] }
  0x9a   :  { %v1030_v34 = vmul.f32 %v1016_v29, %v1003_v32  ;;  %v1032_v36 = vmul.f32 %v1024_v30, %v1005_v33  ;;  %v1031_v61 = vmul.f32 %v1020_v53, %v1002_v54  ;;  %v1211_v1 = vrot.slane %v2377_v48, %v2206_v10  ;;  %v2102_v27 = vld [vmem:[%s2684_s1 + $0x48] sm:$0xff]   ;;  %v1791_v32 = vld [vmem:[%s2686_s2 + $0x10] sm:$0xff] }
  0x9b   :  { %v1059_v15 = vand.u32 %v1033_v2, %v2235_v35  ;;  %1805 = vperm.xlu0 %2089, %v1791_v32   ;;  %v1418_v54 = vrot.slane %v2419_v0, %v2208_v11 }
  0x9c   :  { %1996 = vmatmul.mubr.msk.bf16.gmra.mxu0 %vm142_vm4, %v2096_v7  ;;  %1998 = vmatmul.mubr.msk.bf16.gmra.mxu1 %vm142_vm4, %v2096_v7  ;;  %v1034_v39 = vpack.c.bf16 %v1030_v34, %v1030_v34  ;;  %v1036_v40 = vpack.c.bf16 %v1032_v36, %v1032_v36  ;;  %v1193_v41 = vpop.permute.xlu0 %1192  ;;  %v1195_v42 = vpop.permute.xlu1 %1194  ;;  %v1035_v3 = vpack.c.bf16 %v1031_v61, %v1031_v61  ;;  %v1789_v36 = vld [vmem:[%s2686_s2] sm:$0xff] }
  0x9d   :  { %514 = vmatprep.mubr.bf16.mxu0 %v2113_v6  ;;  %567 = vmatprep.mubr.bf16.mxu1 %v2113_v6 }
  0x9e   :  { %v1062_v46 = vand.u32 %v1034_v39, %v2235_v35  ;;  %v1068_v47 = vand.u32 %v1036_v40, %v2235_v35  ;;  %v1065_v16 = vand.u32 %v1035_v3, %v2235_v35  ;;  %1795 = vperm.xlu1 %2090, %v1789_v36   ;;  %v1790_v39 = vld [vmem:[%s2686_s2 + $0x8] sm:$0xff] }
  0x9f   :  { %1800 = vperm.xlu0 %2089, %v1790_v39  }
  0xa0   :  { %v1197_v50 = vpop.permute.xlu0 %1196  ;;  %v1199_v51 = vpop.permute.xlu1 %1198 }
  0xa1   :  { %v1202_v58 = vsel %vm1200_vm8, %v1195_v42, %v1197_v50  ;;  %v1204_v59 = vsel %vm1200_vm8, %v1199_v51, %v1193_v41 }
  0xa2   :  { %v1229_v62 = vmul.f32 %v1215_v55, %v1202_v58  ;;  %v1231_v63 = vmul.f32 %v1223_v56, %v1204_v59  ;;  %v1613_v56 = vrot.slane %v2065_v49, %v2210_v12  ;;  %v2104_v58 = vld [vmem:[%s2684_s1 + $0x58] sm:$0xff]  }
  0xa4   :  { %2006 = vmatmul.mubr.msk.bf16.vlgmr.msra.gmra.mxu0 %vm142_vm4, %v2097_v21  ;;  %2008 = vmatmul.mubr.msk.bf16.vlgmr.msra.gmra.mxu1 %vm142_vm4, %v2097_v21  ;;  %v1233_v4 = vpack.c.bf16 %v1229_v62, %v1229_v62  ;;  %v1235_v5 = vpack.c.bf16 %v1231_v63, %v1231_v63  ;;  %v2403_v7 = vpop.permute.xlu0 %1391  ;;  %v2405_v8 = vpop.permute.xlu1 %1393  ;;  %v1203_v21 = vsel %vm1200_vm8, %v1193_v41, %v1195_v42  ;;  %v1855_v62 = vld [vmem:[%s2687_s4] sm:$0xff] }
  0xa5   :  { %696 = vmatpush1.bf16.msra.mxu0 %v670_v22  ;;  %749 = vmatpush1.bf16.msra.mxu1 %v676_v23  ;;  %v1219_v22 = vrot.slane %v2377_v48, %v2208_v11  ;;  %v1201_v23 = vsel %vm1200_vm8, %v1197_v50, %v1199_v51  ;;  %v1228_v30 = vmul.f32 %v1211_v1, %v1203_v21 }
  0xa6   :  { %524 = vmatprep.mubr.bf16.mxu0 %v2113_v6  ;;  %577 = vmatprep.mubr.bf16.mxu1 %v2113_v6  ;;  %v1261_v17 = vand.u32 %v1233_v4, %v2235_v35  ;;  %v1267_v18 = vand.u32 %v1235_v5, %v2235_v35  ;;  %v1410_v50 = vrot.slane %v2419_v0, %v2206_v10 }
  0xa7   :  { %885 = vmatprep.subr.bf16.mxu0 %v863_v24  ;;  %938 = vmatprep.subr.bf16.mxu1 %v869_v25  ;;  %v1414_v24 = vrot.slane %v2419_v0, %v2210_v12  ;;  %v1422_v25 = vrot.slane %v2419_v0, %v2212_v13  ;;  %v1232_v37 = vpack.c.bf16 %v1228_v30, %v1228_v30  ;;  %v1856_v12 = vld [vmem:[%s2687_s4 + $0x8] sm:$0xff] }
  0xa8   :  { %v1396_v19 = vpop.permute.xlu0 %1395  ;;  %v1398_v20 = vpop.permute.xlu1 %1397  ;;  %v1402_v53 = vsel %vm1399_vm9, %v2403_v7, %v2405_v8  ;;  %1859 = vperm.xlu1 %2090, %v1855_v62   ;;  %1864 = vperm.xlu0 %2089, %v1856_v12   ;;  %v1617_v1 = vrot.slane %v2065_v49, %v2208_v11 }
  0xa9   :  { %v1401_v28 = vsel %vm1399_vm9, %v2405_v8, %v1396_v19  ;;  %v1403_v29 = vsel %vm1399_vm9, %v1398_v20, %v2403_v7  ;;  %v1400_v55 = vsel %vm1399_vm9, %v1396_v19, %v1398_v20  ;;  %v1427_v61 = vmul.f32 %v1410_v50, %v1402_v53  ;;  %v2105_v8 = vld [vmem:[%s2684_s1 + $0x60] sm:$0xff]   ;;  %v2106_v20 = vld [vmem:[%s2684_s1 + $0x68] sm:$0xff]  }
  0xaa   :  { %v1428_v33 = vmul.f32 %v1414_v24, %v1401_v28  ;;  %v1430_v34 = vmul.f32 %v1422_v25, %v1403_v29  ;;  %v2108_v25 = vld [vmem:[%s2684_s1 + $0x78] sm:$0xff]  }
  0xab   :  { %v1431_v3 = vpack.c.bf16 %v1427_v61, %v1427_v61 }
  0xac   :  { %2007 = vmatmul.mubr.msk.bf16.gmra.mxu0 %vm142_vm4, %v2098_v31  ;;  %2009 = vmatmul.mubr.msk.bf16.gmra.mxu1 %vm142_vm4, %v2098_v31  ;;  %v1230_v31 = vmul.f32 %v1219_v22, %v1201_v23  ;;  %v1432_v40 = vpack.c.bf16 %v1428_v33, %v1428_v33  ;;  %v1434_v41 = vpack.c.bf16 %v1430_v34, %v1430_v34  ;;  %v1591_v42 = vpop.permute.xlu0 %1590 }
  0xad   :  { %713 = vmatprep.mubr.bf16.mxu0 %v2113_v6  ;;  %766 = vmatprep.mubr.bf16.mxu1 %v2113_v6 }
  0xae   :  { %v1234_v38 = vpack.c.bf16 %v1230_v31, %v1230_v31  ;;  %v1466_v48 = vand.u32 %v1434_v41, %v2235_v35 }
  0xb0   :  { %v1595_v51 = vpop.permute.xlu0 %1594 }
  0xb4   :  { %2017 = vmatmul.mubr.msk.bf16.vlgmr.msra.gmra.mxu0 %vm142_vm4, %v2099_v43  ;;  %2019 = vmatmul.mubr.msk.bf16.vlgmr.msra.gmra.mxu1 %vm142_vm4, %v2099_v43  ;;  %v1593_v43 = vpop.permute.xlu1 %1592 }
  0xb5   :  { %723 = vmatprep.mubr.bf16.mxu0 %v2113_v6  ;;  %776 = vmatprep.mubr.bf16.mxu1 %v2113_v6  ;;  %v1600_v59 = vsel %vm1598_vm10, %v1593_v43, %v1595_v51  ;;  %v1601_v0 = vsel %vm1598_vm10, %v1591_v42, %v1593_v43 }
  0xb6   :  { %886 = vmatpush1.bf16.msra.mxu0 %v860_v44  ;;  %939 = vmatpush1.bf16.msra.mxu1 %v866_v45  ;;  %v2103_v44 = vld [vmem:[%s2684_s1 + $0x50] sm:$0xff]   ;;  %v1258_v45 = vand.u32 %v1232_v37, %v2235_v35  ;;  %v1627_v63 = vmul.f32 %v1613_v56, %v1600_v59 }
  0xb7   :  { %1084 = vmatprep.subr.bf16.mxu0 %v1062_v46  ;;  %1137 = vmatprep.subr.bf16.mxu1 %v1068_v47  ;;  %v1264_v46 = vand.u32 %v1234_v38, %v2235_v35  ;;  %v1460_v47 = vand.u32 %v1432_v40, %v2235_v35 }
  0xb8   :  { %v1597_v52 = vpop.permute.xlu1 %1596  ;;  %v1631_v5 = vpack.c.bf16 %v1627_v63, %v1627_v63 }
  0xb9   :  { %v1602_v60 = vsel %vm1598_vm10, %v1597_v52, %v1591_v42  ;;  %v1599_v19 = vsel %vm1598_vm10, %v1595_v51, %v1597_v52 }
  0xba   :  { %v1628_v22 = vmul.f32 %v1617_v1, %v1599_v19 }
  0xbc   :  { %2018 = vmatmul.mubr.msk.bf16.gmra.mxu0 %vm142_vm4, %v2100_v57  ;;  %2020 = vmatmul.mubr.msk.bf16.gmra.mxu1 %vm142_vm4, %v2100_v57  ;;  %v1621_v57 = vrot.slane %v2065_v49, %v2212_v13  ;;  %v1429_v13 = vmul.f32 %v1418_v54, %v1400_v55  ;;  %v1632_v11 = vpack.c.bf16 %v1628_v22, %v1628_v22 }
  0xbd   :  { %903 = vmatprep.mubr.bf16.mxu0 %v2113_v6  ;;  %956 = vmatprep.mubr.bf16.mxu1 %v2113_v6 }
  0xbe   :  { %v1629_v2 = vmul.f32 %v1621_v57, %v1602_v60  ;;  %v1433_v4 = vpack.c.bf16 %v1429_v13, %v1429_v13  ;;  %v1662_v24 = vand.u32 %v1632_v11, %v2235_v35 }
  0xc0   :  { %v1633_v7 = vpack.c.bf16 %v1629_v2, %v1629_v2 }
  0xc4   :  { %2028 = vmatmul.mubr.msk.bf16.vlgmr.msra.gmra.mxu0 %vm142_vm4, %v2101_v14  ;;  %2030 = vmatmul.mubr.msk.bf16.vlgmr.msra.gmra.mxu1 %vm142_vm4, %v2101_v14  ;;  %v1457_v14 = vand.u32 %v1431_v3, %v2235_v35 }
  0xc5   :  { %1085 = vmatpush1.bf16.msra.mxu0 %v1059_v15  ;;  %913 = vmatprep.mubr.bf16.mxu0 %v2113_v6  ;;  %v1463_v15 = vand.u32 %v1433_v4, %v2235_v35 }
  0xc6   :  { %966 = vmatprep.mubr.bf16.mxu1 %v2113_v6  ;;  %1138 = vmatpush1.bf16.msra.mxu1 %v1065_v16  ;;  %v1659_v16 = vand.u32 %v1631_v5, %v2235_v35 }
  0xc7   :  { %1283 = vmatprep.subr.bf16.mxu0 %v1261_v17  ;;  %1336 = vmatprep.subr.bf16.mxu1 %v1267_v18  ;;  %v1665_v17 = vand.u32 %v1633_v7, %v2235_v35  ;;  %v1609_v18 = vrot.slane %v2065_v49, %v2206_v10 }
  0xc9   :  { %v1626_v21 = vmul.f32 %v1609_v18, %v1601_v0 }
  0xcb   :  { %v1630_v10 = vpack.c.bf16 %v1626_v21, %v1626_v21 }
  0xcc   :  { %2029 = vmatmul.mubr.msk.bf16.gmra.mxu0 %vm142_vm4, %v2102_v27  ;;  %2031 = vmatmul.mubr.msk.bf16.gmra.mxu1 %vm142_vm4, %v2102_v27 }
  0xcd   :  { %1102 = vmatprep.mubr.bf16.mxu0 %v2113_v6  ;;  %1155 = vmatprep.mubr.bf16.mxu1 %v2113_v6  ;;  %v1656_v23 = vand.u32 %v1630_v10, %v2235_v35  ;;  %v2109_v35 = vld [vmem:[%s2684_s1 + $0x80] sm:$0xff]  }
  0xd4   :  { %2039 = vmatmul.mubr.msk.bf16.vlgmr.msra.gmra.mxu0 %vm142_vm4, %v2103_v44  ;;  %2041 = vmatmul.mubr.msk.bf16.vlgmr.msra.gmra.mxu1 %vm142_vm4, %v2103_v44 }
  0xd5   :  { %1284 = vmatpush1.bf16.msra.mxu0 %v1258_v45  ;;  %1112 = vmatprep.mubr.bf16.mxu0 %v2113_v6 }
  0xd6   :  { %1165 = vmatprep.mubr.bf16.mxu1 %v2113_v6  ;;  %1337 = vmatpush1.bf16.msra.mxu1 %v1264_v46 }
  0xd7   :  { %1482 = vmatprep.subr.bf16.mxu0 %v1460_v47  ;;  %1535 = vmatprep.subr.bf16.mxu1 %v1466_v48 }
  0xdc   :  { %2040 = vmatmul.mubr.msk.bf16.gmra.mxu0 %vm142_vm4, %v2104_v58  ;;  %2042 = vmatmul.mubr.msk.bf16.gmra.mxu1 %vm142_vm4, %v2104_v58 }
  0xdd   :  { %1301 = vmatprep.mubr.bf16.mxu0 %v2113_v6  ;;  %1354 = vmatprep.mubr.bf16.mxu1 %v2113_v6 }
  0xe4   :  { %2050 = vmatmul.mubr.msk.bf16.vlgmr.msra.gmra.mxu0 %vm142_vm4, %v2105_v8  ;;  %2052 = vmatmul.mubr.msk.bf16.vlgmr.msra.gmra.mxu1 %vm142_vm4, %v2105_v8 }
  0xe5   :  { %1483 = vmatpush1.bf16.msra.mxu0 %v1457_v14  ;;  %1311 = vmatprep.mubr.bf16.mxu0 %v2113_v6 }
  0xe6   :  { %1364 = vmatprep.mubr.bf16.mxu1 %v2113_v6  ;;  %1536 = vmatpush1.bf16.msra.mxu1 %v1463_v15 }
  0xe7   :  { %1681 = vmatprep.subr.bf16.mxu0 %v1659_v16  ;;  %1734 = vmatprep.subr.bf16.mxu1 %v1665_v17 }
  0xec   :  { %2051 = vmatmul.mubr.msk.bf16.gmra.mxu0 %vm142_vm4, %v2106_v20  ;;  %2053 = vmatmul.mubr.msk.bf16.gmra.mxu1 %vm142_vm4, %v2106_v20 }
  0xed   :  { %1500 = vmatprep.mubr.bf16.mxu0 %v2113_v6  ;;  %1553 = vmatprep.mubr.bf16.mxu1 %v2113_v6 }
  0xf4   :  { %2061 = vmatmul.mubr.msk.bf16.vlgmr.msra.gmra.mxu0 %vm142_vm4, %v2107_v9  ;;  %2063 = vmatmul.mubr.msk.bf16.vlgmr.msra.gmra.mxu1 %vm142_vm4, %v2107_v9 }
  0xf5   :  { %1682 = vmatpush1.bf16.msra.mxu0 %v1656_v23  ;;  %1510 = vmatprep.mubr.bf16.mxu0 %v2113_v6 }
  0xf6   :  { %1563 = vmatprep.mubr.bf16.mxu1 %v2113_v6  ;;  %1735 = vmatpush1.bf16.msra.mxu1 %v1662_v24 }
  0xfc   :  { %2062 = vmatmul.mubr.msk.bf16.gmra.mxu0 %vm142_vm4, %v2108_v25  ;;  %2064 = vmatmul.mubr.msk.bf16.gmra.mxu1 %vm142_vm4, %v2108_v25 }
  0xfd   :  { %1699 = vmatprep.mubr.bf16.mxu0 %v2113_v6  ;;  %1752 = vmatprep.mubr.bf16.mxu1 %v2113_v6 }
 0x104   :  { %2072 = vmatmul.mubr.msk.bf16.vlgmr.msra.gmra.mxu0 %vm142_vm4, %v2109_v35  ;;  %2074 = vmatmul.mubr.msk.bf16.vlgmr.msra.gmra.mxu1 %vm142_vm4, %v2109_v35 }
 0x105   :  { %1709 = vmatprep.mubr.bf16.mxu0 %v2113_v6  ;;  %1762 = vmatprep.mubr.bf16.mxu1 %v2113_v6 }
 0x10c   :  { %2073 = vmatmul.mubr.msk.bf16.gmra.mxu0 %vm142_vm4, %v2110_v26  ;;  %2075 = vmatmul.mubr.msk.bf16.gmra.mxu1 %vm142_vm4, %v2110_v26 }
 0x10d   :  { %1908 = vmatprep.mubr.bf16.mxu0 %v2113_v6  ;;  %1951 = vmatprep.mubr.bf16.mxu1 %v2113_v6 }
 0x144   :  { %v199_v27 = vpop.f32.mrf.mxu0  ;;  %v252_v28 = vpop.f32.mrf.mxu1 }
 0x146   :  { %v201_v29 = vpop.f32.mrf.mxu0  ;;  %v254_v30 = vpop.f32.mrf.mxu1 }
 0x148   :  { %v203_v31 = vpop.f32.mrf.mxu0  ;;  %v256_v32 = vpop.f32.mrf.mxu1 }
 0x14a   :  { %v205_v33 = vpop.f32.mrf.mxu0  ;;  %v258_v34 = vpop.f32.mrf.mxu1 }
 0x14c   :  { %v209_v36 = vpop.f32.mrf.mxu0  ;;  %v262_v37 = vpop.f32.mrf.mxu1 }
 0x14e   :  { %v211_v38 = vpop.f32.mrf.mxu0  ;;  %v264_v39 = vpop.f32.mrf.mxu1 }
 0x150   :  { %v213_v40 = vpop.f32.mrf.mxu0  ;;  %v266_v41 = vpop.f32.mrf.mxu1 }
 0x152   :  { %v215_v42 = vpop.f32.mrf.mxu0  ;;  %v268_v43 = vpop.f32.mrf.mxu1 }
 0x154   :  { %v333_v44 = vpop.f32.mrf.mxu0  ;;  %v386_v45 = vpop.f32.mrf.mxu1 }
 0x155   :  { %v334_v46 = vadd.f32 %v333_v44, %v199_v27  ;;  %v387_v6 = vadd.f32 %v386_v45, %v252_v28 }
 0x156   :  { %v335_v47 = vpop.f32.mrf.mxu0  ;;  %v388_v48 = vpop.f32.mrf.mxu1 }
 0x157   :  { %v336_v49 = vadd.f32 %v335_v47, %v201_v29  ;;  %v389_v50 = vadd.f32 %v388_v48, %v254_v30 }
 0x158   :  { %v337_v51 = vpop.f32.mrf.mxu0  ;;  %v390_v52 = vpop.f32.mrf.mxu1 }
 0x159   :  { %v338_v53 = vadd.f32 %v337_v51, %v203_v31  ;;  %v391_v54 = vadd.f32 %v390_v52, %v256_v32 }
 0x15a   :  { %v339_v55 = vpop.f32.mrf.mxu0  ;;  %v392_v56 = vpop.f32.mrf.mxu1 }
 0x15b   :  { %v340_v57 = vadd.f32 %v339_v55, %v205_v33  ;;  %v393_v58 = vadd.f32 %v392_v56, %v258_v34 }
 0x15c   :  { %v343_v59 = vpop.f32.mrf.mxu0  ;;  %v396_v60 = vpop.f32.mrf.mxu1 }
 0x15d   :  { %v344_v61 = vadd.f32 %v343_v59, %v209_v36  ;;  %v397_v62 = vadd.f32 %v396_v60, %v262_v37 }
 0x15e   :  { %v345_v12 = vpop.f32.mrf.mxu0  ;;  %v398_v13 = vpop.f32.mrf.mxu1 }
 0x15f   :  { %v346_v63 = vadd.f32 %v345_v12, %v211_v38  ;;  %v399_v2 = vadd.f32 %v398_v13, %v264_v39 }
 0x160   :  { %v347_v3 = vpop.f32.mrf.mxu0  ;;  %v400_v4 = vpop.f32.mrf.mxu1 }
 0x161   :  { %v348_v5 = vadd.f32 %v347_v3, %v213_v40  ;;  %v401_v7 = vadd.f32 %v400_v4, %v266_v41 }
 0x162   :  { %v349_v8 = vpop.f32.mrf.mxu0  ;;  %v402_v14 = vpop.f32.mrf.mxu1 }
 0x163   :  { %v350_v15 = vadd.f32 %v349_v8, %v215_v42  ;;  %v403_v16 = vadd.f32 %v402_v14, %v268_v43 }
 0x164   :  { %v516_v17 = vpop.f32.mrf.mxu0  ;;  %v569_v18 = vpop.f32.mrf.mxu1 }
 0x165   :  { %v588_v0 = vadd.f32 %v516_v17, %v334_v46  ;;  %v590_v1 = vadd.f32 %v569_v18, %v387_v6 }
 0x166   :  { %v518_v19 = vpop.f32.mrf.mxu0  ;;  %v571_v20 = vpop.f32.mrf.mxu1 }
 0x167   :  { %v589_v21 = vadd.f32 %v518_v19, %v336_v49  ;;  %v591_v22 = vadd.f32 %v571_v20, %v389_v50 }
 0x168   :  { %v520_v10 = vpop.f32.mrf.mxu0  ;;  %v573_v11 = vpop.f32.mrf.mxu1 }
 0x169   :  { %v592_v9 = vadd.f32 %v520_v10, %v338_v53  ;;  %v594_v23 = vadd.f32 %v573_v11, %v391_v54 }
 0x16a   :  { %v522_v24 = vpop.f32.mrf.mxu0  ;;  %v575_v25 = vpop.f32.mrf.mxu1 }
 0x16b   :  { %v593_v35 = vadd.f32 %v522_v24, %v340_v57  ;;  %v595_v26 = vadd.f32 %v575_v25, %v393_v58 }
 0x16c   :  { %v526_v27 = vpop.f32.mrf.mxu0  ;;  %v579_v28 = vpop.f32.mrf.mxu1 }
 0x16d   :  { %v596_v29 = vadd.f32 %v526_v27, %v344_v61  ;;  %v598_v30 = vadd.f32 %v579_v28, %v397_v62 }
 0x16e   :  { %v528_v31 = vpop.f32.mrf.mxu0  ;;  %v581_v32 = vpop.f32.mrf.mxu1 }
 0x16f   :  { %v597_v33 = vadd.f32 %v528_v31, %v346_v63  ;;  %v599_v34 = vadd.f32 %v581_v32, %v399_v2 }
 0x170   :  { %v530_v36 = vpop.f32.mrf.mxu0  ;;  %v583_v37 = vpop.f32.mrf.mxu1 }
 0x171   :  { %v600_v38 = vadd.f32 %v530_v36, %v348_v5  ;;  %v602_v39 = vadd.f32 %v583_v37, %v401_v7 }
 0x172   :  { %v532_v40 = vpop.f32.mrf.mxu0  ;;  %v585_v41 = vpop.f32.mrf.mxu1 }
 0x173   :  { %v601_v42 = vadd.f32 %v532_v40, %v350_v15  ;;  %v603_v43 = vadd.f32 %v585_v41, %v403_v16 }
 0x174   :  { %v715_v44 = vpop.f32.mrf.mxu0  ;;  %v768_v45 = vpop.f32.mrf.mxu1 }
 0x175   :  { %v787_v46 = vadd.f32 %v715_v44, %v588_v0  ;;  %v789_v6 = vadd.f32 %v768_v45, %v590_v1 }
 0x176   :  { %v717_v47 = vpop.f32.mrf.mxu0  ;;  %v770_v48 = vpop.f32.mrf.mxu1 }
 0x177   :  { %v788_v49 = vadd.f32 %v717_v47, %v589_v21  ;;  %v790_v50 = vadd.f32 %v770_v48, %v591_v22 }
 0x178   :  { %v719_v51 = vpop.f32.mrf.mxu0  ;;  %v772_v52 = vpop.f32.mrf.mxu1 }
 0x179   :  { %v791_v53 = vadd.f32 %v719_v51, %v592_v9  ;;  %v793_v54 = vadd.f32 %v772_v52, %v594_v23 }
 0x17a   :  { %v721_v55 = vpop.f32.mrf.mxu0  ;;  %v774_v56 = vpop.f32.mrf.mxu1 }
 0x17b   :  { %v792_v57 = vadd.f32 %v721_v55, %v593_v35  ;;  %v794_v58 = vadd.f32 %v774_v56, %v595_v26 }
 0x17c   :  { %v725_v59 = vpop.f32.mrf.mxu0  ;;  %v778_v60 = vpop.f32.mrf.mxu1 }
 0x17d   :  { %v2559_v61 = vadd.f32 %v725_v59, %v596_v29  ;;  %v2561_v62 = vadd.f32 %v778_v60, %v598_v30 }
 0x17e   :  { %v727_v12 = vpop.f32.mrf.mxu0  ;;  %v780_v13 = vpop.f32.mrf.mxu1 }
 0x17f   :  { %v2563_v63 = vadd.f32 %v727_v12, %v597_v33  ;;  %v2565_v2 = vadd.f32 %v780_v13, %v599_v34 }
 0x180   :  { %v729_v3 = vpop.f32.mrf.mxu0  ;;  %v782_v4 = vpop.f32.mrf.mxu1 }
 0x181   :  { %v2567_v5 = vadd.f32 %v729_v3, %v600_v38  ;;  %v2569_v7 = vadd.f32 %v782_v4, %v602_v39 }
 0x182   :  { %v731_v8 = vpop.f32.mrf.mxu0  ;;  %v784_v14 = vpop.f32.mrf.mxu1 }
 0x183   :  { %v2571_v15 = vadd.f32 %v731_v8, %v601_v42  ;;  %v2573_v16 = vadd.f32 %v784_v14, %v603_v43 }
 0x184   :  { %v905_v17 = vpop.f32.mrf.mxu0  ;;  %v958_v18 = vpop.f32.mrf.mxu1 }
 0x185   :  { %v2575_v0 = vadd.f32 %v905_v17, %v787_v46  ;;  %v2577_v1 = vadd.f32 %v958_v18, %v789_v6 }
 0x186   :  { %v907_v19 = vpop.f32.mrf.mxu0  ;;  %v960_v20 = vpop.f32.mrf.mxu1 }
 0x187   :  { %v2579_v21 = vadd.f32 %v907_v19, %v788_v49  ;;  %v2581_v22 = vadd.f32 %v960_v20, %v790_v50 }
 0x188   :  { %v909_v10 = vpop.f32.mrf.mxu0  ;;  %v962_v11 = vpop.f32.mrf.mxu1 }
 0x189   :  { %v2583_v9 = vadd.f32 %v909_v10, %v791_v53  ;;  %v2585_v23 = vadd.f32 %v962_v11, %v793_v54 }
 0x18a   :  { %v911_v24 = vpop.f32.mrf.mxu0  ;;  %v964_v25 = vpop.f32.mrf.mxu1 }
 0x18b   :  { %v2587_v35 = vadd.f32 %v911_v24, %v792_v57  ;;  %v2589_v26 = vadd.f32 %v964_v25, %v794_v58 }
 0x18c   :  { %v915_v27 = vpop.f32.mrf.mxu0  ;;  %v968_v28 = vpop.f32.mrf.mxu1 }
 0x18d   :  { %2690 = vst [vmem:[#allocation2_spill] sm:$0xff] %v2587_v35  ;;  %2691 = vst [vmem:[#allocation3_spill] sm:$0xff] %v2589_v26 }
 0x18e   :  { %v917_v29 = vpop.f32.mrf.mxu0  ;;  %v970_v30 = vpop.f32.mrf.mxu1 }
 0x190   :  { %v919_v31 = vpop.f32.mrf.mxu0  ;;  %v972_v32 = vpop.f32.mrf.mxu1 }
 0x192   :  { %v921_v33 = vpop.f32.mrf.mxu0  ;;  %v974_v34 = vpop.f32.mrf.mxu1 }
 0x194   :  { %v1104_v36 = vpop.f32.mrf.mxu0  ;;  %v1157_v37 = vpop.f32.mrf.mxu1 }
 0x196   :  { %v1106_v38 = vpop.f32.mrf.mxu0  ;;  %v1159_v39 = vpop.f32.mrf.mxu1 }
 0x198   :  { %v1108_v40 = vpop.f32.mrf.mxu0  ;;  %v1161_v41 = vpop.f32.mrf.mxu1 }
 0x19a   :  { %v1110_v42 = vpop.f32.mrf.mxu0  ;;  %v1163_v43 = vpop.f32.mrf.mxu1 }
 0x19c   :  { %v1114_v44 = vpop.f32.mrf.mxu0  ;;  %v1167_v45 = vpop.f32.mrf.mxu1 }
 0x19e   :  { %v1116_v46 = vpop.f32.mrf.mxu0  ;;  %v1169_v6 = vpop.f32.mrf.mxu1 }
 0x1a0   :  { %v1118_v47 = vpop.f32.mrf.mxu0  ;;  %v1171_v48 = vpop.f32.mrf.mxu1 }
 0x1a2   :  { %v1120_v49 = vpop.f32.mrf.mxu0  ;;  %v1173_v50 = vpop.f32.mrf.mxu1 }
 0x1a4   :  { %v1303_v51 = vpop.f32.mrf.mxu0  ;;  %v1356_v52 = vpop.f32.mrf.mxu1 }
 0x1a6   :  { %v1305_v53 = vpop.f32.mrf.mxu0  ;;  %v1358_v54 = vpop.f32.mrf.mxu1 }
 0x1a8   :  { %v1307_v55 = vpop.f32.mrf.mxu0  ;;  %v1360_v56 = vpop.f32.mrf.mxu1 }
 0x1aa   :  { %v1309_v57 = vpop.f32.mrf.mxu0  ;;  %v1362_v58 = vpop.f32.mrf.mxu1 }
 0x1ac   :  { %v1313_v59 = vpop.f32.mrf.mxu0  ;;  %v1366_v60 = vpop.f32.mrf.mxu1 }
 0x1ae   :  { %v1315_v12 = vpop.f32.mrf.mxu0  ;;  %v1368_v13 = vpop.f32.mrf.mxu1 }
 0x1b0   :  { %v2591_v3 = vpop.f32.mrf.mxu0  ;;  %v2593_v4 = vpop.f32.mrf.mxu1 }
 0x1b1   :  { %2692 = vst [vmem:[#allocation4_spill] sm:$0xff] %v2591_v3  ;;  %2693 = vst [vmem:[#allocation5_spill] sm:$0xff] %v2593_v4  ;;  %v985_v3 = vadd.f32 %v915_v27, %v2559_v61  ;;  %v987_v4 = vadd.f32 %v968_v28, %v2561_v62  ;;  %v1176_v61 = vadd.f32 %v1104_v36, %v2575_v0 }
 0x1b2   :  { %v2595_v8 = vpop.f32.mrf.mxu0  ;;  %v2597_v14 = vpop.f32.mrf.mxu1  ;;  %v1178_v62 = vadd.f32 %v1157_v37, %v2577_v1 }
 0x1b3   :  { %2694 = vst [vmem:[#allocation6_spill] sm:$0xff] %v2595_v8  ;;  %2695 = vst [vmem:[#allocation7_spill] sm:$0xff] %v2597_v14  ;;  %v986_v8 = vadd.f32 %v917_v29, %v2563_v63  ;;  %v988_v14 = vadd.f32 %v970_v30, %v2565_v2  ;;  %v1177_v63 = vadd.f32 %v1106_v38, %v2579_v21  ;;  %v2700_v30 = vld [vmem:[#allocation2_spill] sm:$0xff]  ;;  %v2627_v38 = vpop.permute.xlu1 %1810 }
 0x1b4   :  { %v1502_v17 = vpop.f32.mrf.mxu0  ;;  %v1555_v18 = vpop.f32.mrf.mxu1  ;;  %v1179_v2 = vadd.f32 %v1159_v39, %v2581_v22  ;;  %v1180_v29 = vadd.f32 %v1108_v40, %v2583_v9  ;;  %v1375_v39 = vadd.f32 %v1303_v51, %v1176_v61  ;;  %v1377_v9 = vadd.f32 %v1356_v52, %v1178_v62 }
 0x1b5   :  { %v1187_v0 = vadd.f32 %v1169_v6, %v988_v14  ;;  %v1376_v40 = vadd.f32 %v1305_v53, %v1177_v63  ;;  %v2633_v6 = vpop.permute.xlu0 %1805 }
 0x1b6   :  { %v1504_v19 = vpop.f32.mrf.mxu0  ;;  %v1557_v20 = vpop.f32.mrf.mxu1 }
 0x1b7   :  { %v1386_v52 = vadd.f32 %v1368_v13, %v1187_v0  ;;  %v1575_v53 = vadd.f32 %v1504_v19, %v1376_v40 }
 0x1b8   :  { %v2599_v10 = vpop.f32.mrf.mxu0  ;;  %v2601_v11 = vpop.f32.mrf.mxu1 }
 0x1b9   :  { %2696 = vst [vmem:[#allocation8_spill] sm:$0xff] %v2599_v10  ;;  %2697 = vst [vmem:[#allocation9_spill] sm:$0xff] %v2601_v11  ;;  %v989_v10 = vadd.f32 %v919_v31, %v2567_v5  ;;  %v991_v11 = vadd.f32 %v972_v32, %v2569_v7  ;;  %v1182_v5 = vadd.f32 %v1161_v41, %v2585_v23  ;;  %v2701_v31 = vld [vmem:[#allocation3_spill] sm:$0xff] }
 0x1ba   :  { %v2603_v24 = vpop.f32.mrf.mxu0  ;;  %v2605_v25 = vpop.f32.mrf.mxu1  ;;  %v1181_v7 = vadd.f32 %v1110_v42, %v2700_v30  ;;  %v1184_v32 = vadd.f32 %v1114_v44, %v985_v3  ;;  %v1378_v23 = vadd.f32 %v1358_v54, %v1179_v2 }
 0x1bb   :  { %2698 = vst [vmem:[#allocation10_spill] sm:$0xff] %v2603_v24  ;;  %2699 = vst [vmem:[#allocation11_spill] sm:$0xff] %v2605_v25  ;;  %v990_v24 = vadd.f32 %v921_v33, %v2571_v15  ;;  %v992_v25 = vadd.f32 %v974_v34, %v2573_v16  ;;  %v1183_v15 = vadd.f32 %v1163_v43, %v2701_v31 }
 0x1bc   :  { %v2611_v26 = vpop.f32.mrf.mxu0  ;;  %v2613_v35 = vpop.f32.mrf.mxu1  ;;  %v1186_v16 = vadd.f32 %v1167_v45, %v987_v4  ;;  %v1185_v33 = vadd.f32 %v1116_v46, %v986_v8  ;;  %v1188_v36 = vadd.f32 %v1118_v47, %v989_v10  ;;  %v1190_v21 = vadd.f32 %v1171_v48, %v991_v11  ;;  %v2702_v8 = vld [vmem:[#allocation4_spill] sm:$0xff]  ;;  %v2703_v10 = vld [vmem:[#allocation5_spill] sm:$0xff] }
 0x1bd   :  { %v1189_v37 = vadd.f32 %v1120_v49, %v990_v24  ;;  %v1191_v22 = vadd.f32 %v1173_v50, %v992_v25  ;;  %v1379_v43 = vadd.f32 %v1307_v55, %v1180_v29  ;;  %v1381_v44 = vadd.f32 %v1360_v56, %v1182_v5  ;;  %v2704_v24 = vld [vmem:[#allocation6_spill] sm:$0xff] }
 0x1be   :  { %v1514_v27 = vpop.f32.mrf.mxu0  ;;  %v1567_v28 = vpop.f32.mrf.mxu1  ;;  %v1380_v45 = vadd.f32 %v1309_v57, %v1181_v7  ;;  %v1382_v46 = vadd.f32 %v1362_v58, %v1183_v15  ;;  %v1383_v47 = vadd.f32 %v1313_v59, %v1184_v32  ;;  %v1385_v48 = vadd.f32 %v1366_v60, %v1186_v16  ;;  %v2705_v59 = vld [vmem:[#allocation7_spill] sm:$0xff] }
 0x1bf   :  { %v1574_v49 = vadd.f32 %v1502_v17, %v1375_v39  ;;  %v1576_v50 = vadd.f32 %v1555_v18, %v1377_v9  ;;  %v1384_v51 = vadd.f32 %v1315_v12, %v1185_v33  ;;  %v1577_v54 = vadd.f32 %v1557_v20, %v1378_v23  ;;  %v1796_v17 = vpop.permute.xlu1 %1795  ;;  %v1801_v16 = vpop.permute.xlu0 %1800 }
 0x1c0   :  { %v1516_v34 = vpop.f32.mrf.mxu0  ;;  %v1569_v1 = vpop.f32.mrf.mxu1  ;;  %v1387_v14 = vadd.f32 %v2702_v8, %v1188_v36  ;;  %v1389_v11 = vadd.f32 %v2703_v10, %v1190_v21  ;;  %v1388_v25 = vadd.f32 %v2704_v24, %v1189_v37  ;;  %v1390_v60 = vadd.f32 %v2705_v59, %v1191_v22  ;;  %v2706_v62 = vld [vmem:[#allocation8_spill] sm:$0xff]  ;;  %v2707_v13 = vld [vmem:[#allocation9_spill] sm:$0xff] }
 0x1c1   :  { %v1578_v12 = vadd.f32 %v2706_v62, %v1379_v43  ;;  %v1580_v19 = vadd.f32 %v2707_v13, %v1381_v44  ;;  %v1582_v7 = vadd.f32 %v2611_v26, %v1383_v47  ;;  %v1584_v31 = vadd.f32 %v2613_v35, %v1385_v48 }
 0x1c2   :  { %v2629_v41 = vpop.f32.mrf.mxu0  ;;  %v2631_v42 = vpop.f32.mrf.mxu1  ;;  %v2708_v20 = vld [vmem:[#allocation10_spill] sm:$0xff]  ;;  %v2709_v2 = vld [vmem:[#allocation11_spill] sm:$0xff]  ;;  %v1583_v15 = vadd.f32 %v1514_v27, %v1384_v51  ;;  %v1585_v32 = vadd.f32 %v1567_v28, %v1386_v52  ;;  %v1586_v43 = vadd.f32 %v1516_v34, %v1387_v14  ;;  %v1588_v44 = vadd.f32 %v1569_v1, %v1389_v11 }
 0x1c3   :  { %v1579_v63 = vadd.f32 %v2708_v20, %v1380_v45  ;;  %v1581_v29 = vadd.f32 %v2709_v2, %v1382_v46 }
 0x1c4   :  { %v1701_v3 = vpop.f32.mrf.mxu0  ;;  %v1754_v4 = vpop.f32.mrf.mxu1 }
 0x1c5   :  { %v1773_v55 = vadd.f32 %v1701_v3, %v1574_v49  ;;  %v1775_v56 = vadd.f32 %v1754_v4, %v1576_v50 }
 0x1c6   :  { %v1703_v57 = vpop.f32.mrf.mxu0  ;;  %v1756_v58 = vpop.f32.mrf.mxu1 }
 0x1c7   :  { %v1774_v18 = vadd.f32 %v1703_v57, %v1575_v53  ;;  %v1776_v61 = vadd.f32 %v1756_v58, %v1577_v54  ;;  %v1813_v33 = vadd.f32 %v1796_v17, %v1773_v55  ;;  %v1815_v0 = vadd.f32 %v1796_v17, %v1775_v56 }
 0x1c8   :  { %v1705_v5 = vpop.f32.mrf.mxu0  ;;  %v1758_v30 = vpop.f32.mrf.mxu1  ;;  %v1587_v57 = vadd.f32 %v2629_v41, %v1388_v25  ;;  %v1589_v58 = vadd.f32 %v2631_v42, %v1390_v60 }
 0x1c9   :  { %v1777_v36 = vadd.f32 %v1705_v5, %v1578_v12  ;;  %v1779_v21 = vadd.f32 %v1758_v30, %v1580_v19  ;;  %v1814_v39 = vadd.f32 %v1796_v17, %v1774_v18  ;;  %v1816_v9 = vadd.f32 %v1796_v17, %v1776_v61 }
 0x1ca   :  { %v1707_v37 = vpop.f32.mrf.mxu0  ;;  %v1760_v22 = vpop.f32.mrf.mxu1  ;;  %v1829_v49 = vmax.f32 %v1813_v33, 0.0  ;;  %v1831_v50 = vmax.f32 %v1815_v0, 0.0 }
 0x1cb   :  { %v1778_v40 = vadd.f32 %v1707_v37, %v1579_v63  ;;  %v1780_v23 = vadd.f32 %v1760_v22, %v1581_v29  ;;  %v1817_v45 = vadd.f32 %v1801_v16, %v1777_v36  ;;  %v1819_v46 = vadd.f32 %v1801_v16, %v1779_v21  ;;  %v1860_v21 = vpop.permute.xlu1 %1859 }
 0x1cc   :  { %v1711_v26 = vpop.f32.mrf.mxu0  ;;  %v1764_v47 = vpop.f32.mrf.mxu1  ;;  %v1830_v53 = vmax.f32 %v1814_v39, 0.0  ;;  %v1832_v54 = vmax.f32 %v1816_v9, 0.0 }
 0x1cd   :  { %v1818_v35 = vadd.f32 %v1801_v16, %v1778_v40  ;;  %v1820_v27 = vadd.f32 %v1801_v16, %v1780_v23  ;;  %v1781_v28 = vadd.f32 %v1711_v26, %v1582_v7  ;;  %v1783_v48 = vadd.f32 %v1764_v47, %v1584_v31 }
 0x1ce   :  { %v1833_v3 = vmax.f32 %v1817_v45, 0.0  ;;  %v1835_v4 = vmax.f32 %v1819_v46, 0.0  ;;  %v1713_v51 = vpop.f32.mrf.mxu0  ;;  %v1766_v52 = vpop.f32.mrf.mxu1 }
 0x1cf   :  { %v1782_v8 = vadd.f32 %v1713_v51, %v1583_v15  ;;  %v1784_v10 = vadd.f32 %v1766_v52, %v1585_v32  ;;  %v1834_v14 = vmax.f32 %v1818_v35, 0.0  ;;  %v1836_v11 = vmax.f32 %v1820_v27, 0.0 }
 0x1d0   :  { %v1715_v34 = vpop.f32.mrf.mxu0  ;;  %v1768_v1 = vpop.f32.mrf.mxu1  ;;  %v1847_v55 = vpack.c.bf16 %v1833_v3, %v1829_v49  ;;  %v1849_v56 = vpack.c.bf16 %v1835_v4, %v1831_v50  ;;  %v1821_v24 = vadd.f32 %v2633_v6, %v1781_v28  ;;  %v1823_v59 = vadd.f32 %v2633_v6, %v1783_v48 }
 0x1d1   :  { %v1785_v17 = vadd.f32 %v1715_v34, %v1586_v43  ;;  %v1787_v18 = vadd.f32 %v1768_v1, %v1588_v44  ;;  %v1848_v12 = vpack.c.bf16 %v1834_v14, %v1830_v53  ;;  %v1850_v13 = vpack.c.bf16 %v1836_v11, %v1832_v54  ;;  %v1865_v43 = vpop.permute.xlu0 %1864 }
 0x1d2   :  { %v1717_v61 = vpop.f32.mrf.mxu0  ;;  %v1770_v62 = vpop.f32.mrf.mxu1  ;;  %v1822_v19 = vadd.f32 %v2633_v6, %v1782_v8  ;;  %v1824_v20 = vadd.f32 %v2633_v6, %v1784_v10  ;;  %v1837_v29 = vmax.f32 %v1821_v24, 0.0  ;;  %v1839_v5 = vmax.f32 %v1823_v59, 0.0 }
 0x1d3   :  { %v1786_v63 = vadd.f32 %v1717_v61, %v1587_v57  ;;  %v1788_v2 = vadd.f32 %v1770_v62, %v1589_v58  ;;  %v1825_v41 = vadd.f32 %v2627_v38, %v1785_v17  ;;  %v1827_v42 = vadd.f32 %v2627_v38, %v1787_v18 }
 0x1d4   :  { %v1838_v31 = vmax.f32 %v1822_v19, 0.0  ;;  %v1840_v15 = vmax.f32 %v1824_v20, 0.0 }
 0x1d5   :  { %v1826_v25 = vadd.f32 %v2627_v38, %v1786_v63  ;;  %v1828_v60 = vadd.f32 %v2627_v38, %v1788_v2  ;;  %v1841_v30 = vmax.f32 %v1825_v41, 0.0  ;;  %v1843_v7 = vmax.f32 %v1827_v42, 0.0  ;;  %v2111_v38 = vld [vmem:[%s2688_s3] sm:$0xff]  }
 0x1d7   :  { %v1842_v32 = vmax.f32 %v1826_v25, 0.0  ;;  %v1844_v16 = vmax.f32 %v1828_v60, 0.0  ;;  %v1851_v33 = vpack.c.bf16 %v1841_v30, %v1837_v29  ;;  %v1853_v6 = vpack.c.bf16 %v1843_v7, %v1839_v5 }
 0x1d9   :  { %v1852_v0 = vpack.c.bf16 %v1842_v32, %v1838_v31  ;;  %v1854_v36 = vpack.c.bf16 %v1844_v16, %v1840_v15 }
 0x1db   :  { %1888 = vmatprep.subr.bf16.mxu0 %v1852_v0  ;;  %1931 = vmatprep.subr.bf16.mxu1 %v1854_v36 }
 0x1dc   :  { %1889 = vmatpush1.bf16.msra.mxu0 %v1851_v33  ;;  %1932 = vmatpush1.bf16.msra.mxu1 %v1853_v6 }
 0x1dd   :  { %1890 = vmatprep.subr.bf16.mxu0 %v1848_v12  ;;  %1933 = vmatprep.subr.bf16.mxu1 %v1850_v13 }
 0x1e0   :  { %1891 = vmatpush1.bf16.msra.mxu0 %v1847_v55  ;;  %1934 = vmatpush1.bf16.msra.mxu1 %v1849_v56 }
 0x1e3   :  { %2077 = vmatmul.mubr.msk.bf16.vlgmr.msra.gmra.mxu0 %vm1872_vm11, %v2111_v38  ;;  %2078 = vmatmul.mubr.msk.bf16.vlgmr.msra.gmra.mxu1 %vm1872_vm11, %v2111_v38 }
 0x2a3   :  { %v1910_v37 = vpop.f32.mrf.mxu0  ;;  %v1953_v22 = vpop.f32.mrf.mxu1 }
 0x2a4   :  { %v1911_v39 = vadd.f32 %v1910_v37, %v1860_v21  ;;  %v1954_v9 = vadd.f32 %v1953_v22, %v1860_v21 }
 0x2a5   :  { %v1912_v40 = vpop.f32.mrf.mxu0  ;;  %v1955_v23 = vpop.f32.mrf.mxu1 }
 0x2a6   :  { %1962 = vst [vmem:[%s2689_s6] sm:$0xff] %v1911_v39  ;;  %1964 = vst [vmem:[%s2689_s6 + $0x10] sm:$0xff] %v1954_v9  ;;  %v1913_v44 = vadd.f32 %v1912_v40, %v1860_v21  ;;  %v1956_v45 = vadd.f32 %v1955_v23, %v1860_v21 }
 0x2a7   :  { %v1914_v46 = vpop.f32.mrf.mxu0  ;;  %v1957_v26 = vpop.f32.mrf.mxu1 }
 0x2a8   :  { %1963 = vst [vmem:[%s2689_s6 + $0x8] sm:$0xff] %v1913_v44  ;;  %1965 = vst [vmem:[%s2689_s6 + $0x18] sm:$0xff] %v1956_v45  ;;  %v1915_v47 = vadd.f32 %v1914_v46, %v1865_v43  ;;  %v1958_v35 = vadd.f32 %v1957_v26, %v1865_v43 }
 0x2a9   :  { %v1916_v27 = vpop.f32.mrf.mxu0  ;;  %v1959_v28 = vpop.f32.mrf.mxu1 }
 0x2aa   :  { %1966 = vst [vmem:[%s2689_s6 + $0x20] sm:$0xff] %v1915_v47  ;;  %1968 = vst [vmem:[%s2689_s6 + $0x30] sm:$0xff] %v1958_v35  ;;  %v1917_v48 = vadd.f32 %v1916_v27, %v1865_v43  ;;  %v1960_v49 = vadd.f32 %v1959_v28, %v1865_v43 }
 0x2ac   :  { %1967 = vst [vmem:[%s2689_s6 + $0x28] sm:$0xff] %v1917_v48  ;;  %1969 = vst [vmem:[%s2689_s6 + $0x38] sm:$0xff] %v1960_v49 }

</bundles_post_ra>
